<compile_context>
chip_gen: v5e
topology: v5e:2x2
jax: 0.10.0
libtpu: 0.0.40
codegen_flags: <defaults>
</compile_context>

<pallas_src>
import functools

import jax
import jax.numpy as jnp
from jax.experimental import pallas as pl
from jax.experimental.pallas import tpu as pltpu


_DROPOUT_PS = (0.1, 0.2, 0.25)


def _round_up(v, m):
    return ((v + m - 1) // m) * m


def _dropout(h, p):
    """Training-mode inverted dropout: integer threshold on raw PRNG bits."""
    bits = pltpu.bitcast(pltpu.prng_random_bits(h.shape), jnp.uint32)
    thr = jnp.uint32(int(round(p * float(1 << 32))))
    keep = bits >= thr                                  # P(keep) = 1 - p
    return jnp.where(keep, h * (1.0 / (1.0 - p)), 0.0)


def _mlp_kernel(seed_ref, x_ref, w0_ref, b0_ref, w1_ref, b1_ref,
                w2_ref, b2_ref, o_ref, *, training, num_valid_out):
    if training:
        # Hash (base seed, tile index) together so batch tiles draw independent
        # streams and nearby base seeds never alias across tiles.
        pltpu.prng_seed(seed_ref[0], pl.program_id(0))

    # fc0 + ReLU (+ dropout 0.1). x tile cast to bf16 in-register (f32 in HBM),
    # bf16 MXU operands with f32 accumulation.
    h = jnp.dot(x_ref[...].astype(jnp.bfloat16), w0_ref[...],
                preferred_element_type=jnp.float32)
    h = jnp.maximum(h + b0_ref[...], 0.0)
    if training:
        h = _dropout(h, _DROPOUT_PS[0])

    # fc1 + ReLU (+ dropout 0.2)
    h = jnp.dot(h.astype(jnp.bfloat16), w1_ref[...],
                preferred_element_type=jnp.float32)
    h = jnp.maximum(h + b1_ref[...], 0.0)
    if training:
        h = _dropout(h, _DROPOUT_PS[1])

    # fc2 + ReLU (+ dropout 0.25)   (ReLU after the last Linear matches the spec)
    h = jnp.dot(h.astype(jnp.bfloat16), w2_ref[...],
                preferred_element_type=jnp.float32)
    h = jnp.maximum(h + b2_ref[...], 0.0)
    if training:
        h = _dropout(h, _DROPOUT_PS[2])

    # log_softmax over the (lane-padded) class axis; mask pad lanes so the
    # zero-padded columns contribute nothing to max / sum-exp.
    if num_valid_out != h.shape[-1]:
        lane = jax.lax.broadcasted_iota(jnp.int32, h.shape, 1)
        h = jnp.where(lane < num_valid_out, h, jnp.float32(-1e30))
    m = jnp.max(h, axis=-1, keepdims=True)
    shifted = h - m
    lse = jnp.log(jnp.sum(jnp.exp(shifted), axis=-1, keepdims=True))
    o_ref[...] = (shifted - lse).astype(o_ref.dtype)   # bf16 store (lane-dense)


def _choose_tile_m(n, tile_m):
    """Clamp tile_m to the batch and prefer >= 2 grid steps (v7x megacore)."""
    n8 = _round_up(max(n, 1), 8)
    tm = max(8, min(_round_up(tile_m, 8), n8))
    if n8 // tm < 2 and n8 >= 16:
        # Single-step grid would idle one TensorCore on v7x; splitting costs
        # ~0.35 us extra on 1-TC chips, which is negligible.
        tm = _round_up(pl.cdiv(n8, 2), 8)
    return tm


def dropout_nn_forward(x, params, *, training=False, seed=0, tile_m=2048):
    """Forward pass of DropoutNeuralNetwork.

    x: any shape whose trailing dims flatten to image_size (e.g. (N,1,H,W)).
    params: torch-convention weights:
        w0:(H1,IMG) b0:(H1,)  w1:(H2,H1) b1:(H2,)  w2:(OUT,H2) b2:(OUT,)
    Returns f32 log-probs of shape (N, OUT).
    """
    w0, b0 = params["w0"], params["b0"]
    w1, b1 = params["w1"], params["b1"]
    w2, b2 = params["w2"], params["b2"]

    image_size = w0.shape[1]
    h1 = w0.shape[0]
    h2 = w1.shape[0]
    out_size = w2.shape[0]
    out_pad = _round_up(out_size, 128)            # lane-dense output store

    # x.view(-1, image_size); pad batch rows to a multiple of the row tile.
    # NOTE: x stays f32 here (no extra wrapper-side bf16 pass over x in HBM);
    # the kernel casts the tile to bf16 in-register.
    x2 = x.reshape(-1, image_size).astype(jnp.float32)
    n = x2.shape[0]
    tile_m = _choose_tile_m(n, tile_m)
    n_pad = _round_up(n, tile_m)
    if n_pad != n:
        x2 = jnp.pad(x2, ((0, n_pad - n), (0, 0)))

    # bf16 weights (MXU operands), f32 biases.
    w0t = w0.T.astype(jnp.bfloat16)
    w1t = w1.T.astype(jnp.bfloat16)
    w2t = jnp.pad(w2.T, ((0, 0), (0, out_pad - out_size))).astype(jnp.bfloat16)
    b0r = b0.reshape(1, -1).astype(jnp.float32)
    b1r = b1.reshape(1, -1).astype(jnp.float32)
    b2r = jnp.pad(b2, (0, out_pad - out_size)).reshape(1, -1).astype(jnp.float32)
    seed_arr = jnp.array([seed], dtype=jnp.int32)

    grid = (n_pad // tile_m,)
    resident = lambda i, s: (0, 0)                # weights/biases: same block each step

    grid_spec = pltpu.PrefetchScalarGridSpec(
        num_scalar_prefetch=1,                    # seed -> SMEM
        grid=grid,
        in_specs=[
            pl.BlockSpec((tile_m, image_size), lambda i, s: (i, 0)),   # x tile (f32)
            pl.BlockSpec((image_size, h1), resident),                  # w0
            pl.BlockSpec((1, h1), resident),                           # b0
            pl.BlockSpec((h1, h2), resident),                          # w1
            pl.BlockSpec((1, h2), resident),                           # b1
            pl.BlockSpec((h2, out_pad), resident),                     # w2 (padded)
            pl.BlockSpec((1, out_pad), resident),                      # b2 (padded)
        ],
        out_specs=pl.BlockSpec((tile_m, out_pad), lambda i, s: (i, 0)),
    )

    # VMEM budget: double-buffered f32 x tiles + bf16 out tiles + resident weights.
    vmem_est = (2 * tile_m * image_size * 4
                + 2 * tile_m * out_pad * 2
                + (image_size * h1 + h1 * h2 + h2 * out_pad) * 2
                + (h1 + h2 + out_pad) * 4)
    vmem_limit = int(min(max(4 * vmem_est, 16 * 1024 * 1024), 48 * 1024 * 1024))

    cost = pl.CostEstimate(
        flops=2 * n_pad * (image_size * h1 + h1 * h2 + h2 * out_pad),
        transcendentals=n_pad * (out_pad + 1),
        bytes_accessed=(x2.size * 4
                        + (w0t.size + w1t.size + w2t.size) * 2
                        + (b0r.size + b1r.size + b2r.size) * 4
                        + n_pad * out_pad * 2),
    )

    kernel = functools.partial(_mlp_kernel, training=training,
                               num_valid_out=out_size)
    out = pl.pallas_call(
        kernel,
        out_shape=jax.ShapeDtypeStruct((n_pad, out_pad), jnp.bfloat16),
        grid_spec=grid_spec,
        compiler_params=pltpu.CompilerParams(
            dimension_semantics=("parallel",),
            vmem_limit_bytes=vmem_limit,
        ),
        cost_estimate=cost,
    )(seed_arr, x2, w0t, b0r, w1t, b1r, w2t, b2r)

    # TODO(synk): when the log-probs feed straight into an NLL loss, fuse the
    # label gather into the kernel (emit n x 1) and skip this slice pass.
    return out[:n, :out_size].astype(jnp.float32)


def _init_params(key, image_size, h1, h2, out):
    """Deterministic init matching torch.nn.Linear shapes (uniform +-1/sqrt(fan_in))."""
    ks = jax.random.split(key, 6)

    def lin(kw, kb, fan_in, fan_out):
        bound = 1.0 / jnp.sqrt(fan_in)
        w = jax.random.uniform(kw, (fan_out, fan_in), jnp.float32, -bound, bound)
        b = jax.random.uniform(kb, (fan_out,), jnp.float32, -bound, bound)
        return w, b

    w0, b0 = lin(ks[0], ks[1], image_size, h1)
    w1, b1 = lin(ks[2], ks[3], h1, h2)
    w2, b2 = lin(ks[4], ks[5], h2, out)
    return {"w0": w0, "b0": b0, "w1": w1, "b1": b1, "w2": w2, "b2": b2}


def _reference(x, params):
    """Pure-JAX f32 eval-mode reference (exact module semantics)."""
    image_size = params["w0"].shape[1]
    h = x.reshape(-1, image_size).astype(jnp.float32)
    h = jnp.maximum(h @ params["w0"].T + params["b0"], 0.0)
    h = jnp.maximum(h @ params["w1"].T + params["b1"], 0.0)
    h = jnp.maximum(h @ params["w2"].T + params["b2"], 0.0)
    return jax.nn.log_softmax(h, axis=1)


if __name__ == "__main__":
    # Small MNIST-flavoured shapes: image_size=64 (8x8), hidden1=32, hidden2=32, out=10.
    IMAGE_SIZE, H1, H2, OUT = 64, 32, 32, 10
    BATCH = 2

    key = jax.random.PRNGKey(0)
    k_x, k_p, k_x2 = jax.random.split(key, 3)
    params = _init_params(k_p, IMAGE_SIZE, H1, H2, OUT)

    # Primary run: batch=2 (single grid step; too small to split across cores).
    x = jax.random.normal(k_x, (BATCH, 1, 8, 8), dtype=jnp.float32)
    out = jax.block_until_ready(dropout_nn_forward(x, params, training=False))
    ref = _reference(x, params)
    assert out.shape == (BATCH, OUT)
    assert jnp.allclose(out, ref, atol=3e-2, rtol=3e-2), "mismatch vs reference"

    # Secondary run: multiple grid steps (batch 40 -> padded 48, tile_m=16 -> 3 steps).
    xb = jax.random.normal(k_x2, (40, 1, 8, 8), dtype=jnp.float32)
    outb = jax.block_until_ready(
        dropout_nn_forward(xb, params, training=False, tile_m=16))
    refb = _reference(xb, params)
    assert outb.shape == (40, OUT)
    assert jnp.allclose(outb, refb, atol=3e-2, rtol=3e-2), "mismatch vs reference (tiled)"

    # Tertiary run: default tile_m path with a batch big enough to auto-split
    # into >= 2 grid steps (v7x two-TensorCore sharding).
    xc = jax.random.normal(k_x, (48, 1, 8, 8), dtype=jnp.float32)
    outc = jax.block_until_ready(dropout_nn_forward(xc, params, training=False))
    refc = _reference(xc, params)
    assert outc.shape == (48, OUT)
    assert jnp.allclose(outc, refc, atol=3e-2, rtol=3e-2), "mismatch vs reference (auto-split)"

    print("KERNEL_OK")
</pallas_src>

<mosaic_0001>
module attributes {stable_mosaic.version = 11 : i64} {
  func.func @_mlp_kernel(%arg0: i32, %arg1: memref<1xi32, #tpu.memory_space<smem>>, %arg2: memref<8x64xf32, #tpu.memory_space<vmem>>, %arg3: memref<64x32xbf16, #tpu.memory_space<vmem>>, %arg4: memref<1x32xf32, #tpu.memory_space<vmem>>, %arg5: memref<32x32xbf16, #tpu.memory_space<vmem>>, %arg6: memref<1x32xf32, #tpu.memory_space<vmem>>, %arg7: memref<32x128xbf16, #tpu.memory_space<vmem>>, %arg8: memref<1x128xf32, #tpu.memory_space<vmem>>, %arg9: memref<8x128xbf16, #tpu.memory_space<vmem>>) attributes {dimension_semantics = [#tpu.dimension_semantics<parallel>], iteration_bounds = array<i64: 1>, scalar_prefetch = 1 : i64, scratch_operands = 0 : i64, tpu.core_type = #tpu.core_type<tc>, window_params = [{transform_indices = @transform_0, window_bounds = array<i64: 8, 64>}, {pipeline_mode = #tpu.pipeline_mode<synchronous>, transform_indices = @transform_1, window_bounds = array<i64: 64, 32>}, {pipeline_mode = #tpu.pipeline_mode<synchronous>, transform_indices = @transform_2, window_bounds = array<i64: 1, 32>}, {pipeline_mode = #tpu.pipeline_mode<synchronous>, transform_indices = @transform_3, window_bounds = array<i64: 32, 32>}, {pipeline_mode = #tpu.pipeline_mode<synchronous>, transform_indices = @transform_4, window_bounds = array<i64: 1, 32>}, {pipeline_mode = #tpu.pipeline_mode<synchronous>, transform_indices = @transform_5, window_bounds = array<i64: 32, 128>}, {pipeline_mode = #tpu.pipeline_mode<synchronous>, transform_indices = @transform_6, window_bounds = array<i64: 1, 128>}, {transform_indices = @transform_7, window_bounds = array<i64: 8, 128>}]} {
    %c0 = arith.constant 0 : index
    %c0_0 = arith.constant 0 : index
    %0 = vector.load %arg2[%c0, %c0_0] : memref<8x64xf32, #tpu.memory_space<vmem>>, vector<8x64xf32>
    %1 = arith.truncf %0 : vector<8x64xf32> to vector<8x64xbf16>
    %c0_1 = arith.constant 0 : index
    %c0_2 = arith.constant 0 : index
    %2 = vector.load %arg3[%c0_1, %c0_2] : memref<64x32xbf16, #tpu.memory_space<vmem>>, vector<64x32xbf16>
    %cst = arith.constant dense<0.000000e+00> : vector<8x32xf32>
    %3 = tpu.matmul %1, %2, %cst {dimension_numbers = #tpu.dot_dimension_numbers<[1], [0], [0], [1], [0, 0, 1, 1], [], []>} : vector<8x64xbf16>, vector<64x32xbf16>, vector<8x32xf32> -> vector<8x32xf32>
    %c0_3 = arith.constant 0 : index
    %c0_4 = arith.constant 0 : index
    %4 = vector.load %arg4[%c0_3, %c0_4] : memref<1x32xf32, #tpu.memory_space<vmem>>, vector<1x32xf32>
    %5 = vector.broadcast %4 : vector<1x32xf32> to vector<8x32xf32>
    %6 = arith.addf %3, %5 : vector<8x32xf32>
    %cst_5 = arith.constant 0.000000e+00 : f32
    %7 = vector.broadcast %cst_5 : f32 to vector<8x32xf32>
    %8 = arith.maximumf %6, %7 : vector<8x32xf32>
    %9 = arith.truncf %8 : vector<8x32xf32> to vector<8x32xbf16>
    %c0_6 = arith.constant 0 : index
    %c0_7 = arith.constant 0 : index
    %10 = vector.load %arg5[%c0_6, %c0_7] : memref<32x32xbf16, #tpu.memory_space<vmem>>, vector<32x32xbf16>
    %cst_8 = arith.constant dense<0.000000e+00> : vector<8x32xf32>
    %11 = tpu.matmul %9, %10, %cst_8 {dimension_numbers = #tpu.dot_dimension_numbers<[1], [0], [0], [1], [0, 0, 1, 1], [], []>} : vector<8x32xbf16>, vector<32x32xbf16>, vector<8x32xf32> -> vector<8x32xf32>
    %c0_9 = arith.constant 0 : index
    %c0_10 = arith.constant 0 : index
    %12 = vector.load %arg6[%c0_9, %c0_10] : memref<1x32xf32, #tpu.memory_space<vmem>>, vector<1x32xf32>
    %13 = vector.broadcast %12 : vector<1x32xf32> to vector<8x32xf32>
    %14 = arith.addf %11, %13 : vector<8x32xf32>
    %cst_11 = arith.constant 0.000000e+00 : f32
    %15 = vector.broadcast %cst_11 : f32 to vector<8x32xf32>
    %16 = arith.maximumf %14, %15 : vector<8x32xf32>
    %17 = arith.truncf %16 : vector<8x32xf32> to vector<8x32xbf16>
    %c0_12 = arith.constant 0 : index
    %c0_13 = arith.constant 0 : index
    %18 = vector.load %arg7[%c0_12, %c0_13] : memref<32x128xbf16, #tpu.memory_space<vmem>>, vector<32x128xbf16>
    %cst_14 = arith.constant dense<0.000000e+00> : vector<8x128xf32>
    %19 = tpu.matmul %17, %18, %cst_14 {dimension_numbers = #tpu.dot_dimension_numbers<[1], [0], [0], [1], [0, 0, 1, 1], [], []>} : vector<8x32xbf16>, vector<32x128xbf16>, vector<8x128xf32> -> vector<8x128xf32>
    %c0_15 = arith.constant 0 : index
    %c0_16 = arith.constant 0 : index
    %20 = vector.load %arg8[%c0_15, %c0_16] : memref<1x128xf32, #tpu.memory_space<vmem>>, vector<1x128xf32>
    %21 = vector.broadcast %20 : vector<1x128xf32> to vector<8x128xf32>
    %22 = arith.addf %19, %21 : vector<8x128xf32>
    %cst_17 = arith.constant 0.000000e+00 : f32
    %23 = vector.broadcast %cst_17 : f32 to vector<8x128xf32>
    %24 = arith.maximumf %22, %23 : vector<8x128xf32>
    %25 = tpu.iota {dimensions = array<i32: 1>} : vector<8x128xi32>
    %c10_i32 = arith.constant 10 : i32
    %26 = vector.broadcast %c10_i32 : i32 to vector<8x128xi32>
    %27 = arith.cmpi slt, %25, %26 : vector<8x128xi32>
    %cst_18 = arith.constant -1.000000e+30 : f32
    %28 = vector.broadcast %cst_18 : f32 to vector<8x128xf32>
    %29 = arith.select %27, %24, %28 : vector<8x128xi1>, vector<8x128xf32>
    %cst_19 = arith.constant dense<0xFF800000> : vector<8xf32>
    %30 = vector.multi_reduction <maximumf>, %29, %cst_19 [1] : vector<8x128xf32> to vector<8xf32>
    %31 = vector.shape_cast %30 : vector<8xf32> to vector<8x1xf32>
    %32 = vector.broadcast %31 : vector<8x1xf32> to vector<8x128xf32>
    %33 = arith.subf %29, %32 : vector<8x128xf32>
    %34 = math.exp %33 : vector<8x128xf32>
    %cst_20 = arith.constant dense<0.000000e+00> : vector<8xf32>
    %35 = vector.multi_reduction <add>, %34, %cst_20 [1] : vector<8x128xf32> to vector<8xf32>
    %36 = vector.shape_cast %35 : vector<8xf32> to vector<8x1xf32>
    %37 = math.log %36 : vector<8x1xf32>
    %38 = vector.broadcast %37 : vector<8x1xf32> to vector<8x128xf32>
    %39 = arith.subf %33, %38 : vector<8x128xf32>
    %40 = arith.truncf %39 : vector<8x128xf32> to vector<8x128xbf16>
    %c0_21 = arith.constant 0 : index
    %c0_22 = arith.constant 0 : index
    %41 = vector.load %arg9[%c0_21, %c0_22] : memref<8x128xbf16, #tpu.memory_space<vmem>>, vector<8x128xbf16>
    tpu.vector_store %arg9[%c0_21, %c0_22], %40 {strides = array<i32>} : memref<8x128xbf16, #tpu.memory_space<vmem>>, vector<8x128xbf16>,
    return
  }
  func.func @transform_0(%arg0: i32, %arg1: memref<1xi32, #tpu.memory_space<smem>>) -> (i32, i32) {
    %c0_i32 = arith.constant 0 : i32
    %c0_i32_0 = arith.constant 0 : i32
    return %arg0, %c0_i32 : i32, i32
  }
  func.func @transform_1(%arg0: i32, %arg1: memref<1xi32, #tpu.memory_space<smem>>) -> (i32, i32) {
    %c0_i32 = arith.constant 0 : i32
    %c0_i32_0 = arith.constant 0 : i32
    %c0_i32_1 = arith.constant 0 : i32
    return %c0_i32, %c0_i32_0 : i32, i32
  }
  func.func @transform_2(%arg0: i32, %arg1: memref<1xi32, #tpu.memory_space<smem>>) -> (i32, i32) {
    %c0_i32 = arith.constant 0 : i32
    %c0_i32_0 = arith.constant 0 : i32
    %c0_i32_1 = arith.constant 0 : i32
    return %c0_i32, %c0_i32_0 : i32, i32
  }
  func.func @transform_3(%arg0: i32, %arg1: memref<1xi32, #tpu.memory_space<smem>>) -> (i32, i32) {
    %c0_i32 = arith.constant 0 : i32
    %c0_i32_0 = arith.constant 0 : i32
    %c0_i32_1 = arith.constant 0 : i32
    return %c0_i32, %c0_i32_0 : i32, i32
  }
  func.func @transform_4(%arg0: i32, %arg1: memref<1xi32, #tpu.memory_space<smem>>) -> (i32, i32) {
    %c0_i32 = arith.constant 0 : i32
    %c0_i32_0 = arith.constant 0 : i32
    %c0_i32_1 = arith.constant 0 : i32
    return %c0_i32, %c0_i32_0 : i32, i32
  }
  func.func @transform_5(%arg0: i32, %arg1: memref<1xi32, #tpu.memory_space<smem>>) -> (i32, i32) {
    %c0_i32 = arith.constant 0 : i32
    %c0_i32_0 = arith.constant 0 : i32
    %c0_i32_1 = arith.constant 0 : i32
    return %c0_i32, %c0_i32_0 : i32, i32
  }
  func.func @transform_6(%arg0: i32, %arg1: memref<1xi32, #tpu.memory_space<smem>>) -> (i32, i32) {
    %c0_i32 = arith.constant 0 : i32
    %c0_i32_0 = arith.constant 0 : i32
    %c0_i32_1 = arith.constant 0 : i32
    return %c0_i32, %c0_i32_0 : i32, i32
  }
  func.func @transform_7(%arg0: i32, %arg1: memref<1xi32, #tpu.memory_space<smem>>) -> (i32, i32) {
    %c0_i32 = arith.constant 0 : i32
    %c0_i32_0 = arith.constant 0 : i32
    return %arg0, %c0_i32 : i32, i32
  }
}

</mosaic_0001>

<bundles_post_ra>
// kernel: tpu_custom_call.1
= control target key start
LH: loop header
LB: loop body
LE: loop exit
PB: predicated region body
PF: predicated region fallthrough
CT: control target
= control target key end

     0   :  { %s357_s0 = inlined_call_operand.<no memory space> [shape: s32[1], index: 0, kind: input, shape index: {}]   ;;  %s358_s1 = inlined_call_operand.vmem [shape: f32[8,64], index: 1, kind: input, shape index: {}]   ;;  %s359_s2 = inlined_call_operand.vmem [shape: bf16[64,32], index: 2, kind: input, shape index: {}]   ;;  %s360_s3 = inlined_call_operand.vmem [shape: f32[1,32], index: 3, kind: input, shape index: {}]   ;;  %s361_s4 = inlined_call_operand.vmem [shape: bf16[32,32], index: 4, kind: input, shape index: {}]   ;;  %s362_s5 = inlined_call_operand.vmem [shape: f32[1,32], index: 5, kind: input, shape index: {}]   ;;  %s363_s6 = inlined_call_operand.vmem [shape: bf16[32,128], index: 6, kind: input, shape index: {}]   ;;  %s364_s7 = inlined_call_operand.vmem [shape: f32[1,128], index: 7, kind: input, shape index: {}]   ;;  %s365_s8 = inlined_call_operand.hbm [shape: bf16[8,128], index: 8, kind: output, shape index: {}]  }
   0x1   :  { %v233_v0 = vld [vmem:[%s359_s2 + $0x18] sm:$0xff]  ;;  %v232_v1 = vld [vmem:[%s359_s2 + $0x10] sm:$0xff] }
   0x2   :  { %76 = vmatpush.bf16.msra.mxu0 %v233_v0 }
   0x3   :  { %14 = vsyncpa [#allocation5], 0  ;;  %v231_v2 = vld [vmem:[%s359_s2 + $0x8] sm:$0xff]  ;;  %v230_v3 = vld [vmem:[%s359_s2] sm:$0xff]  ;;  %vm68_vm0 = vcmask 523264   ;;  %vm107_vm1 = vcmask 261120   ;;  %v163_v22 = vlaneseq }
   0x4   :  { %v30_v4 = vld [vmem:[%s358_s1] sm:$0xff]  ;;  %v235_v6 = vld [vmem:[%s361_s4 + $0x8] sm:$0xff]  ;;  %s186_s24 = sshll.u32 %s365_s8, 4  ;;  %s187_s24 = int_to_ptr.hbm [resolvable:$true] %s186_s24 }
   0x5   :  { %v31_v5 = vpack.c.bf16 %v30_v4, %v30_v4  ;;  %117 = vmatpush.bf16.msra.mxu1 %v235_v6  ;;  %v234_v7 = vld [vmem:[%s361_s4] sm:$0xff]  ;;  %v237_v14 = vld [vmem:[%s363_s6 + $0x8] sm:$0xff]  ;;  %v164_v24 = vand.u32 127, %v163_v22 }
   0x6   :  { %77 = vmatpush.bf16.msra.mxu0 %v232_v1  ;;  %v239_v8 = vld [vmem:[%s360_s3] ss:$0 sm:$0xff]  ;;  %155 = vmatpush.bf16.msra.mxu2 %v237_v14 }
   0x7   :  { %v236_v15 = vld [vmem:[%s363_s6] sm:$0xff]  ;;  %vm165_vm2 = vcmp.lt.s32.totalorder %v164_v24, 10 }
   0x8   :  { %v240_v16 = vld [vmem:[%s362_s5] ss:$0 sm:$0xff]  ;;  %s272_s5 = smov [#allocation4]  }
   0x9   :  { %118 = vmatpush.bf16.msra.mxu1 %v234_v7  ;;  %v241_v23 = vld [vmem:[%s364_s7] ss:$0 sm:$0xff]  ;;  %s184_s6 = sshll.u32 %s272_s5, 4  ;;  %s185_s6 = int_to_ptr.vmem [resolvable:$true] %s184_s6 }
   0xa   :  { %78 = vmatpush.bf16.msra.mxu0 %v231_v2  ;;  %156 = vmatpush.bf16.msra.mxu2 %v236_v15 }
   0xe   :  { %79 = vmatpush.bf16.msra.mxu0 %v230_v3 }
  0x11   :  { %211 = vmatmul.msk.bf16.vlgmr.msra.gmra.mxu0 %vm68_vm0, %v31_v5 }
  0x8e   :  { %v81_v9 = vpop.f32.mrf.mxu0 }
  0x8f   :  { %v82_v10 = vadd.f32 %v239_v8, %v81_v9 }
  0x91   :  { %v85_v11 = vmax.f32 %v82_v10, 0.0 }
  0x93   :  { %v86_v12 = vpack.c.bf16 %v85_v11, %v85_v11 }
  0x95   :  { %220 = vmatmul.msk.bf16.vlgmr.msra.gmra.mxu1 %vm107_vm1, %v86_v12 }
  0x96   :  { %v83_v13 = vpop.f32.mrf.mxu0 }
 0x112   :  { %v120_v17 = vpop.f32.mrf.mxu1 }
 0x113   :  { %v121_v18 = vadd.f32 %v240_v16, %v120_v17 }
 0x115   :  { %v124_v19 = vmax.f32 %v121_v18, 0.0 }
 0x117   :  { %v125_v20 = vpack.c.bf16 %v124_v19, %v124_v19 }
 0x119   :  { %229 = vmatmul.msk.bf16.vlgmr.msra.gmra.mxu2 %vm107_vm1, %v125_v20 }
 0x11a   :  { %v122_v21 = vpop.f32.mrf.mxu1 }
 0x19c   :  { %v158_v25 = vpop.f32.mrf.mxu2 }
 0x19d   :  { %v159_v26 = vadd.f32 %v241_v23, %v158_v25 }
 0x19f   :  { %v162_v27 = vmax.f32 %v159_v26, 0.0 }
 0x1a1   :  { %v166_v28 = vsel %vm165_vm2, %v162_v27, -1e+30 }
 0x1a2   :  { %167 = vmax.xlane.f32.xlu0 %v166_v28 }
 0x1a4   :  { %v160_v29 = vpop.f32.mrf.mxu2 }
 0x215   :  { %v168_v30 = vpop.xlane.xlu0 %167 }
 0x216   :  { %v169_v31 = vsub.f32 %v166_v28, %v168_v30 }
 0x218   :  { %v170_v32 = vmul.f32 1.442695, %v169_v31 }
 0x21a   :  { %242 = vpow2.f32 %v170_v32 }
 0x220   :  { %v243_v33 = vpop.eup %242 }
 0x221   :  { %172 = vadd.xlane.f32.xlu0 %v243_v33 }
 0x294   :  { %v173_v34 = vpop.xlane.xlu0 %172 }
 0x295   :  { %244 = vlog2.f32 %v173_v34 }
 0x29b   :  { %v245_v35 = vpop.eup %244 }
 0x29c   :  { %v175_v36 = vmul.f32 0.6931472, %v245_v35 }
 0x29e   :  { %v176_v37 = vsub.f32 %v169_v31, %v175_v36 }
 0x2a0   :  { %v177_v38 = vpack.c.bf16 %v176_v37, %v176_v37 }
 0x2a2   :  { %178 = vst [vmem:[#allocation4] sm:$0xf] %v177_v38 }
 0x2a3   :  { %189 = dma.vmem_to_hbm [thread:$0]  %s185_s6, 64, %s187_s24, [#allocation5]  }
 0x2a4   :  { %270 = dma.done.wait [#allocation5], 64  }
 0x2a5   :  { %271 = vsyncadd [#allocation5], 4294967232 }
 0x2a6   :  { %194 = vsyncpa [#allocation5], 1 }

</bundles_post_ra>
